<compile_context>
chip_gen: v7x
topology: tpu7x:2x2x1
jax: 0.10.0
libtpu: 0.0.40
codegen_flags: <defaults>
</compile_context>

<pallas_src>
import functools

import jax
import jax.numpy as jnp
from jax.experimental import pallas as pl
from jax.experimental.pallas import tpu as pltpu

_MIB = 1024 * 1024
_LANES = 128


# ----------------------------------------------------------------------------
# Kernels
# ----------------------------------------------------------------------------
def _gate_kernel(b1_ref, x1_ref, x2_ref, p_ref, o_ref, *, eps):
    """Unpacked path (H >= 128 or not packable): XLU lane reductions."""
    x1 = x1_ref[...]                       # (bm, H)
    x2 = x2_ref[...]                       # (bm, H)
    p = p_ref[...]                         # (4, H) = [W1; W2; gamma; beta]
    w1 = p[0:1, :]
    w2 = p[1:2, :]
    gamma = p[2:3, :]
    beta = p[3:4, :]
    b1 = b1_ref[0]                         # scalar (SMEM)

    # alpha = sigmoid(x1 @ W1.T + B1 + x2 @ W2.T) -> fused single lane-reduce.
    s = jnp.sum(x1 * w1 + x2 * w2, axis=-1, keepdims=True) + b1
    alpha = jax.nn.sigmoid(s)

    # Gated combination: x1*alpha + (1-alpha)*x2 == x2 + alpha*(x1 - x2).
    y = x2 + alpha * (x1 - x2)             # (bm, H)

    # LayerNorm over last dim (biased variance, eps inside rsqrt), affine.
    mean = jnp.mean(y, axis=-1, keepdims=True)
    d = y - mean
    var = jnp.mean(d * d, axis=-1, keepdims=True)
    o_ref[...] = (d * jax.lax.rsqrt(var + eps)) * gamma + beta


def _split_hi_lo(x):
    # Two-term bf16 splitting of an f32 array (error ~2^-18 relative) so the
    # MXU matmuls below can stay plain bf16 x bf16 -> f32.
    hi = x.astype(jnp.bfloat16)
    lo = (x - hi.astype(jnp.float32)).astype(jnp.bfloat16)
    return hi, lo


def _seg_sum(x, seg):
    # Segmented lane-sum of f32 `x`, broadcast back over each segment's lanes,
    # done on the (otherwise idle) MXU with a block-diagonal 0/1 matrix.
    hi, lo = _split_hi_lo(x)
    return (jnp.dot(hi, seg, preferred_element_type=jnp.float32)
            + jnp.dot(lo, seg, preferred_element_type=jnp.float32))


def _gate_kernel_packed(b1_ref, x1_ref, x2_ref, p_ref, seg_ref, o_ref, *,
                        eps, inv_h):
    """Packed path: P=128/H sample rows folded per lane row (lane-dense)."""
    x1 = x1_ref[...]                       # (bm, 128)
    x2 = x2_ref[...]                       # (bm, 128)
    p = p_ref[...]                         # (4, 128) = tiled [W1; W2; gamma; beta]
    w1 = p[0:1, :]
    w2 = p[1:2, :]
    gamma = p[2:3, :]
    beta = p[3:4, :]
    b1 = b1_ref[0]                         # scalar (SMEM)
    seg = seg_ref[...]                     # (128, 128) block-diag 0/1, bf16

    # Gate logit per original row (per 32-lane segment), broadcast in-segment.
    logit = _seg_sum(x1 * w1 + x2 * w2, seg) + b1
    alpha = jax.nn.sigmoid(logit)

    y = x2 + alpha * (x1 - x2)

    # LayerNorm per original row == per segment (two-pass, biased variance).
    mean = _seg_sum(y, seg) * inv_h
    d = y - mean
    var = _seg_sum(d * d, seg) * inv_h
    o_ref[...] = (d * jax.lax.rsqrt(var + eps)) * gamma + beta


# ----------------------------------------------------------------------------
# Tiling policy (generation-aware)
# ----------------------------------------------------------------------------
def _tpu_vmem_capacity_bytes():
    try:
        return int(pltpu.get_tpu_info().vmem_capacity_bytes)
    except Exception:
        return 64 * _MIB  # conservative: v7x physical VMEM


def _num_tensorcores():
    # Megacore parts (v7x, v4/v5p) expose 2 TensorCores to one pallas_call;
    # v5e / v6e have one.  Fallback to 1 only costs a missed 2-way split.
    try:
        kind = jax.devices()[0].device_kind.lower()
    except Exception:
        return 1
    if "v7" in kind or "7x" in kind or "v4" in kind or "v5p" in kind:
        return 2
    return 1


def _auto_block_m(n_rows, lane_width, itemsize=4):
    vmem_cap = _tpu_vmem_capacity_bytes()
    # Scoped-VMEM limit we request: ~96 MiB on 128 MiB parts, ~40 MiB on v7x.
    vmem_limit = min(96 * _MIB, max(32 * _MIB, vmem_cap - 24 * _MIB))
    # Double-buffered x1 / x2 / out tiles must fit, with headroom for the
    # small constant tiles (params, segment matrix) and compiler scratch.
    budget = vmem_limit - 6 * _MIB
    bytes_per_row = lane_width * itemsize
    cap_rows = max(8, (budget // (3 * 2 * bytes_per_row)) // 8 * 8)
    # Byte-target each input tile at ~4 MiB (>=1-2 MiB reaches ~86%+ of HBM
    # roofline; larger buys little and just delays pipeline startup).
    target_rows = max(8, (4 * _MIB // bytes_per_row) // 8 * 8)
    block_m = min(cap_rows, target_rows)
    # Keep >= num_TC grid steps so the "parallel" axis can shard across
    # TensorCores on megacore parts; single big tile on single-TC chips.
    min_steps = _num_tensorcores()
    rows_per_step = -(-n_rows // min_steps)          # ceil(n / steps)
    rows_per_step = max(8, -(-rows_per_step // 8) * 8)  # round up to 8
    block_m = min(block_m, rows_per_step)
    return int(block_m), int(vmem_limit)


# ----------------------------------------------------------------------------
# Wrapper
# ----------------------------------------------------------------------------
def cls_gate_forward(x1, x2, w1, w2, b1, gamma, beta, *,
                     block_m=None, eps=1e-5):
    """Pallas implementation of cls_Gate.forward.

    x1, x2      : (N, H) float32
    w1, w2      : (1, H) float32   (W1, W2 parameters)
    b1          : (1,)   float32   (B1 scalar parameter)
    gamma, beta : (1, H) float32   (LayerNorm affine params)
    """
    N, H = x1.shape
    assert x2.shape == (N, H)

    # Lane-dense packing: fold P = 128/H rows per lane row when possible.
    pack = 1
    if H < _LANES and _LANES % H == 0 and N % (_LANES // H) == 0:
        pack = _LANES // H
    Hp, Np = H * pack, N // pack

    x1p = x1.reshape(Np, Hp)               # row-major reshape: free
    x2p = x2.reshape(Np, Hp)
    w1p = jnp.tile(w1, (1, pack))
    w2p = jnp.tile(w2, (1, pack))
    gp = jnp.tile(gamma, (1, pack))
    bp = jnp.tile(beta, (1, pack))
    # One stacked (4, Hp) constant input -> single tiny constant pipeline.
    params = jnp.concatenate([w1p, w2p, gp, bp], axis=0)

    auto_bm, vmem_limit = _auto_block_m(Np, Hp)
    if block_m is None:
        block_m = auto_bm
    grid = (pl.cdiv(Np, block_m),)

    b1 = jnp.asarray(b1, jnp.float32).reshape((1,))

    if pack > 1:
        # Block-diagonal 0/1 segment matrix (exact in bf16).
        seg_id = jnp.arange(Hp) // H
        seg = (seg_id[:, None] == seg_id[None, :]).astype(jnp.bfloat16)
        kernel = functools.partial(_gate_kernel_packed, eps=eps, inv_h=1.0 / H)
        in_specs = [
            pl.BlockSpec(memory_space=pltpu.SMEM),           # B1 scalar
            pl.BlockSpec((block_m, Hp), lambda i: (i, 0)),   # x1 (packed)
            pl.BlockSpec((block_m, Hp), lambda i: (i, 0)),   # x2 (packed)
            pl.BlockSpec((4, Hp), lambda i: (0, 0)),         # stacked params
            pl.BlockSpec((Hp, Hp), lambda i: (0, 0)),        # segment matrix
        ]
        args = (b1, x1p, x2p, params, seg)
    else:
        kernel = functools.partial(_gate_kernel, eps=eps)
        in_specs = [
            pl.BlockSpec(memory_space=pltpu.SMEM),           # B1 scalar
            pl.BlockSpec((block_m, Hp), lambda i: (i, 0)),   # x1
            pl.BlockSpec((block_m, Hp), lambda i: (i, 0)),   # x2
            pl.BlockSpec((4, Hp), lambda i: (0, 0)),         # stacked params
        ]
        args = (b1, x1p, x2p, params)

    out = pl.pallas_call(
        kernel,
        out_shape=jax.ShapeDtypeStruct((Np, Hp), x1.dtype),
        grid_spec=pltpu.PrefetchScalarGridSpec(
            num_scalar_prefetch=0,
            grid=grid,
            in_specs=in_specs,
            out_specs=pl.BlockSpec((block_m, Hp), lambda i: (i, 0)),
        ),
        compiler_params=pltpu.CompilerParams(
            dimension_semantics=("parallel",),
            vmem_limit_bytes=vmem_limit,
        ),
    )(*args)
    return out.reshape(N, H)


# ----------------------------------------------------------------------------
# Reference + tests
# ----------------------------------------------------------------------------
def _xavier_uniform(key, shape):
    # matches nn.init.xavier_uniform_: bound = sqrt(6 / (fan_in + fan_out))
    fan_out, fan_in = shape
    bound = jnp.sqrt(6.0 / (fan_in + fan_out))
    return jax.random.uniform(key, shape, jnp.float32, -bound, bound)


def reference_forward(x1, x2, w1, w2, b1, gamma, beta, eps=1e-5):
    alpha = jax.nn.sigmoid(x1 @ w1.T + b1 + x2 @ w2.T)
    y = x1 * alpha + (1.0 - alpha) * x2
    mean = jnp.mean(y, axis=-1, keepdims=True)
    var = jnp.mean((y - mean) ** 2, axis=-1, keepdims=True)
    return (y - mean) / jnp.sqrt(var + eps) * gamma + beta


def _run_case(key, n_rows, hidden, tol):
    k_x1, k_x2, k_w1, k_w2, k_b1 = jax.random.split(key, 5)

    W1 = _xavier_uniform(k_w1, (1, hidden))
    W2 = _xavier_uniform(k_w2, (1, hidden))
    B1 = _xavier_uniform(k_b1, (1, 1)).reshape((1,))
    gamma = jnp.ones((1, hidden), jnp.float32)   # LayerNorm weight
    beta = jnp.zeros((1, hidden), jnp.float32)   # LayerNorm bias

    x1 = jax.random.normal(k_x1, (n_rows, hidden), jnp.float32)
    x2 = jax.random.normal(k_x2, (n_rows, hidden), jnp.float32)

    out = cls_gate_forward(x1, x2, W1, W2, B1, gamma, beta)
    out = jax.block_until_ready(out)

    ref = reference_forward(x1, x2, W1, W2, B1[0], gamma, beta)
    assert out.shape == (n_rows, hidden)
    assert jnp.allclose(out, ref, atol=tol, rtol=tol), (
        f"mismatch vs reference at N={n_rows}, H={hidden}")


if __name__ == "__main__":
    key = jax.random.PRNGKey(0)
    k0, k1, k2, k3 = jax.random.split(key, 4)

    # Production-like small shape (batch=8, hidden=32): lane-dense packed
    # path (P=4, MXU segmented reductions, bf16 hi/lo split -> ~1e-4 accurate).
    _run_case(k0, n_rows=8, hidden=32, tol=1e-3)

    # Packed path with more rows (multi-row strips, partial last tile rows).
    _run_case(k1, n_rows=1000, hidden=32, tol=1e-3)

    # Fallback unpacked path at H=32 (N not divisible by the pack factor).
    _run_case(k2, n_rows=10, hidden=32, tol=1e-5)

    # Lane-dense H>=128 path: N not a multiple of block_m (partial last tile).
    _run_case(k3, n_rows=300, hidden=128, tol=1e-5)

    print("KERNEL_OK")
</pallas_src>

<mosaic_0001>
module attributes {stable_mosaic.version = 11 : i64} {
  func.func @_gate_kernel_packed(%arg0: i32, %arg1: memref<1xf32, #tpu.memory_space<smem>>, %arg2: memref<8x128xf32, #tpu.memory_space<vmem>>, %arg3: memref<8x128xf32, #tpu.memory_space<vmem>>, %arg4: memref<4x128xf32, #tpu.memory_space<vmem>>, %arg5: memref<128x128xbf16, #tpu.memory_space<vmem>>, %arg6: memref<8x128xf32, #tpu.memory_space<vmem>>) attributes {dimension_semantics = [#tpu.dimension_semantics<parallel>], iteration_bounds = array<i64: 1>, scalar_prefetch = 0 : i64, scratch_operands = 0 : i64, tpu.core_type = #tpu.core_type<tc>, window_params = [{transform_indices = @transform_0, window_bounds = array<i64: 1>}, {transform_indices = @transform_1, window_bounds = array<i64: 8, 128>}, {transform_indices = @transform_2, window_bounds = array<i64: 8, 128>}, {pipeline_mode = #tpu.pipeline_mode<synchronous>, transform_indices = @transform_3, window_bounds = array<i64: 4, 128>}, {pipeline_mode = #tpu.pipeline_mode<synchronous>, transform_indices = @transform_4, window_bounds = array<i64: 128, 128>}, {transform_indices = @transform_5, window_bounds = array<i64: 8, 128>}]} {
    %c0 = arith.constant 0 : index
    %c0_0 = arith.constant 0 : index
    %0 = vector.load %arg2[%c0, %c0_0] : memref<8x128xf32, #tpu.memory_space<vmem>>, vector<8x128xf32>
    %c0_1 = arith.constant 0 : index
    %c0_2 = arith.constant 0 : index
    %1 = vector.load %arg3[%c0_1, %c0_2] : memref<8x128xf32, #tpu.memory_space<vmem>>, vector<8x128xf32>
    %c0_3 = arith.constant 0 : index
    %c0_4 = arith.constant 0 : index
    %2 = vector.load %arg4[%c0_3, %c0_4] : memref<4x128xf32, #tpu.memory_space<vmem>>, vector<4x128xf32>
    %3 = vector.extract_strided_slice %2 {offsets = [0, 0], sizes = [1, 128], strides = [1, 1]} : vector<4x128xf32> to vector<1x128xf32>
    %4 = vector.extract_strided_slice %2 {offsets = [1, 0], sizes = [1, 128], strides = [1, 1]} : vector<4x128xf32> to vector<1x128xf32>
    %5 = vector.extract_strided_slice %2 {offsets = [2, 0], sizes = [1, 128], strides = [1, 1]} : vector<4x128xf32> to vector<1x128xf32>
    %6 = vector.extract_strided_slice %2 {offsets = [3, 0], sizes = [1, 128], strides = [1, 1]} : vector<4x128xf32> to vector<1x128xf32>
    %c0_5 = arith.constant 0 : index
    %7 = memref.load %arg1[%c0_5] : memref<1xf32, #tpu.memory_space<smem>>
    %c0_6 = arith.constant 0 : index
    %c0_7 = arith.constant 0 : index
    %8 = vector.load %arg5[%c0_6, %c0_7] : memref<128x128xbf16, #tpu.memory_space<vmem>>, vector<128x128xbf16>
    %9 = vector.broadcast %3 : vector<1x128xf32> to vector<8x128xf32>
    %10 = arith.mulf %0, %9 : vector<8x128xf32>
    %11 = vector.broadcast %4 : vector<1x128xf32> to vector<8x128xf32>
    %12 = arith.mulf %1, %11 : vector<8x128xf32>
    %13 = arith.addf %10, %12 : vector<8x128xf32>
    %14 = arith.truncf %13 : vector<8x128xf32> to vector<8x128xbf16>
    %15 = arith.extf %14 : vector<8x128xbf16> to vector<8x128xf32>
    %16 = arith.subf %13, %15 : vector<8x128xf32>
    %17 = arith.truncf %16 : vector<8x128xf32> to vector<8x128xbf16>
    %cst = arith.constant dense<0.000000e+00> : vector<8x128xf32>
    %18 = tpu.matmul %14, %8, %cst {dimension_numbers = #tpu.dot_dimension_numbers<[1], [0], [0], [1], [0, 0, 1, 1], [], []>} : vector<8x128xbf16>, vector<128x128xbf16>, vector<8x128xf32> -> vector<8x128xf32>
    %cst_8 = arith.constant dense<0.000000e+00> : vector<8x128xf32>
    %19 = tpu.matmul %17, %8, %cst_8 {dimension_numbers = #tpu.dot_dimension_numbers<[1], [0], [0], [1], [0, 0, 1, 1], [], []>} : vector<8x128xbf16>, vector<128x128xbf16>, vector<8x128xf32> -> vector<8x128xf32>
    %20 = arith.addf %18, %19 : vector<8x128xf32>
    %21 = vector.broadcast %7 : f32 to vector<8x128xf32>
    %22 = arith.addf %20, %21 : vector<8x128xf32>
    %23 = arith.negf %22 : vector<8x128xf32>
    %24 = math.exp %23 : vector<8x128xf32>
    %cst_9 = arith.constant 1.000000e+00 : f32
    %25 = vector.broadcast %cst_9 : f32 to vector<8x128xf32>
    %26 = arith.addf %25, %24 : vector<8x128xf32>
    %27 = arith.divf %25, %26 : vector<8x128xf32>
    %28 = arith.subf %0, %1 : vector<8x128xf32>
    %29 = arith.mulf %27, %28 : vector<8x128xf32>
    %30 = arith.addf %1, %29 : vector<8x128xf32>
    %31 = arith.truncf %30 : vector<8x128xf32> to vector<8x128xbf16>
    %32 = arith.extf %31 : vector<8x128xbf16> to vector<8x128xf32>
    %33 = arith.subf %30, %32 : vector<8x128xf32>
    %34 = arith.truncf %33 : vector<8x128xf32> to vector<8x128xbf16>
    %cst_10 = arith.constant dense<0.000000e+00> : vector<8x128xf32>
    %35 = tpu.matmul %31, %8, %cst_10 {dimension_numbers = #tpu.dot_dimension_numbers<[1], [0], [0], [1], [0, 0, 1, 1], [], []>} : vector<8x128xbf16>, vector<128x128xbf16>, vector<8x128xf32> -> vector<8x128xf32>
    %cst_11 = arith.constant dense<0.000000e+00> : vector<8x128xf32>
    %36 = tpu.matmul %34, %8, %cst_11 {dimension_numbers = #tpu.dot_dimension_numbers<[1], [0], [0], [1], [0, 0, 1, 1], [], []>} : vector<8x128xbf16>, vector<128x128xbf16>, vector<8x128xf32> -> vector<8x128xf32>
    %37 = arith.addf %35, %36 : vector<8x128xf32>
    %cst_12 = arith.constant 3.125000e-02 : f32
    %38 = vector.broadcast %cst_12 : f32 to vector<8x128xf32>
    %39 = arith.mulf %37, %38 : vector<8x128xf32>
    %40 = arith.subf %30, %39 : vector<8x128xf32>
    %41 = arith.mulf %40, %40 : vector<8x128xf32>
    %42 = arith.truncf %41 : vector<8x128xf32> to vector<8x128xbf16>
    %43 = arith.extf %42 : vector<8x128xbf16> to vector<8x128xf32>
    %44 = arith.subf %41, %43 : vector<8x128xf32>
    %45 = arith.truncf %44 : vector<8x128xf32> to vector<8x128xbf16>
    %cst_13 = arith.constant dense<0.000000e+00> : vector<8x128xf32>
    %46 = tpu.matmul %42, %8, %cst_13 {dimension_numbers = #tpu.dot_dimension_numbers<[1], [0], [0], [1], [0, 0, 1, 1], [], []>} : vector<8x128xbf16>, vector<128x128xbf16>, vector<8x128xf32> -> vector<8x128xf32>
    %cst_14 = arith.constant dense<0.000000e+00> : vector<8x128xf32>
    %47 = tpu.matmul %45, %8, %cst_14 {dimension_numbers = #tpu.dot_dimension_numbers<[1], [0], [0], [1], [0, 0, 1, 1], [], []>} : vector<8x128xbf16>, vector<128x128xbf16>, vector<8x128xf32> -> vector<8x128xf32>
    %48 = arith.addf %46, %47 : vector<8x128xf32>
    %cst_15 = arith.constant 3.125000e-02 : f32
    %49 = vector.broadcast %cst_15 : f32 to vector<8x128xf32>
    %50 = arith.mulf %48, %49 : vector<8x128xf32>
    %cst_16 = arith.constant 9.99999974E-6 : f32
    %51 = vector.broadcast %cst_16 : f32 to vector<8x128xf32>
    %52 = arith.addf %50, %51 : vector<8x128xf32>
    %53 = math.rsqrt %52 : vector<8x128xf32>
    %54 = arith.mulf %40, %53 : vector<8x128xf32>
    %55 = vector.broadcast %5 : vector<1x128xf32> to vector<8x128xf32>
    %56 = arith.mulf %54, %55 : vector<8x128xf32>
    %57 = vector.broadcast %6 : vector<1x128xf32> to vector<8x128xf32>
    %58 = arith.addf %56, %57 : vector<8x128xf32>
    %c0_17 = arith.constant 0 : index
    %c0_18 = arith.constant 0 : index
    %59 = vector.load %arg6[%c0_17, %c0_18] : memref<8x128xf32, #tpu.memory_space<vmem>>, vector<8x128xf32>
    tpu.vector_store %arg6[%c0_17, %c0_18], %58 {strides = array<i32>} : memref<8x128xf32, #tpu.memory_space<vmem>>, vector<8x128xf32>,
    return
  }
  func.func @transform_0(%arg0: i32) -> i32 {
    %c0_i32 = arith.constant 0 : i32
    %c0_i32_0 = arith.constant 0 : i32
    return %c0_i32 : i32
  }
  func.func @transform_1(%arg0: i32) -> (i32, i32) {
    %c0_i32 = arith.constant 0 : i32
    %c0_i32_0 = arith.constant 0 : i32
    return %arg0, %c0_i32 : i32, i32
  }
  func.func @transform_2(%arg0: i32) -> (i32, i32) {
    %c0_i32 = arith.constant 0 : i32
    %c0_i32_0 = arith.constant 0 : i32
    return %arg0, %c0_i32 : i32, i32
  }
  func.func @transform_3(%arg0: i32) -> (i32, i32) {
    %c0_i32 = arith.constant 0 : i32
    %c0_i32_0 = arith.constant 0 : i32
    %c0_i32_1 = arith.constant 0 : i32
    return %c0_i32, %c0_i32_0 : i32, i32
  }
  func.func @transform_4(%arg0: i32) -> (i32, i32) {
    %c0_i32 = arith.constant 0 : i32
    %c0_i32_0 = arith.constant 0 : i32
    %c0_i32_1 = arith.constant 0 : i32
    return %c0_i32, %c0_i32_0 : i32, i32
  }
  func.func @transform_5(%arg0: i32) -> (i32, i32) {
    %c0_i32 = arith.constant 0 : i32
    %c0_i32_0 = arith.constant 0 : i32
    return %arg0, %c0_i32 : i32, i32
  }
}

</mosaic_0001>

<bundles_post_ra>
// kernel: tpu_custom_call.1
= control target key start
LH: loop header
LB: loop body
LE: loop exit
PB: predicated region body
PF: predicated region fallthrough
CT: control target
= control target key end

     0   :  { %11 = vsyncpa [#allocation4], 0  ;;  %s950_s0 = inlined_call_operand.<no memory space> [shape: f32[1], index: 0, kind: input, shape index: {}]   ;;  %s951_s1 = inlined_call_operand.vmem [shape: f32[2,128], index: 1, kind: input, shape index: {}]   ;;  %s952_s2 = inlined_call_operand.hbm [shape: f32[2,128], index: 2, kind: input, shape index: {}]   ;;  %s953_s3 = inlined_call_operand.vmem [shape: f32[4,128], index: 3, kind: input, shape index: {}]   ;;  %s954_s4 = inlined_call_operand.hbm [shape: bf16[128,128], index: 4, kind: input, shape index: {}]   ;;  %s955_s5 = inlined_call_operand.hbm [shape: f32[2,128], index: 5, kind: output, shape index: {}]  }
   0x1   :  { %12 = vsyncpa [#allocation7], 0 }
   0x2   :  { %13 = vsyncpa [#allocation5], 0 }
   0x3   :  { %22 = vsyncadd [#allocation4], 96  ;;  %s715_s18 = smov [#allocation3]   ;;  %s643_s22 = scalar_lea.hbm %s952_s2, 32 }
   0x4   :  { %s23_s19 = sshll.u32 %s715_s18, 4  ;;  %p644_p0 = scmp.ne.s32.totalorder %s952_s2, %s643_s22  ;;  %s24_s19 = int_to_ptr.vmem [resolvable:$true] %s23_s19 }
   0x5   :  { %p647_p1 = scmp.lt.u32.totalorder %s643_s22, %s952_s2 }
   0x7   :  { %p649_p2 = pnand %p647_p1, %p644_p0 }
   0x9   :  { %652 = shalt.err (!%p649_p2)
}
   0xa   :  { %s653_s27 = scalar_lea.vmem %s24_s19, 32  ;;  %s657_s28 = scalar_lea.vmem %s24_s19, 128 }
   0xb   :  { %p654_p3 = scmp.ne.s32.totalorder %s24_s19, %s653_s27  ;;  %p658_p4 = scmp.lt.s32.totalorder %s24_s19, %s24_s19 }
   0xc   :  { %p659_p5 = scmp.lt.s32.totalorder %s657_s28, %s653_s27 }
   0xe   :  { %p660_p6 = por %p659_p5, %p658_p4 }
  0x10   :  { %p661_p7 = pnand %p660_p6, %p654_p3 }
  0x12   :  { %664 = shalt.err (!%p661_p7)
}
  0x13   :  { %s716_s29 = smov 32   ;;  %s717_s30 = smov 2  }
  0x14   :  { %29 = dma.hbm_to_vmem [thread:$0]  %s952_s2, 32, %s24_s19, [#allocation4], %s716_s29, %s716_s29, %s717_s30  }
  0x15   :  { %s718_s8 = smov [#allocation6]   ;;  %s665_s12 = scalar_lea.hbm %s954_s4, 1024 }
  0x16   :  { %s37_s9 = sshll.u32 %s718_s8, 4  ;;  %p666_p8 = scmp.ne.s32.totalorder %s954_s4, %s665_s12  ;;  %s38_s9 = int_to_ptr.vmem [resolvable:$true] %s37_s9 }
  0x17   :  { %p669_p9 = scmp.lt.u32.totalorder %s665_s12, %s954_s4 }
  0x19   :  { %p671_p10 = pnand %p669_p9, %p666_p8 }
  0x1b   :  { %674 = shalt.err (!%p671_p10)
}
  0x1c   :  { %s675_s17 = scalar_lea.vmem %s38_s9, 1024  ;;  %p680_p12 = scmp.lt.s32.totalorder %s38_s9, %s38_s9 }
  0x1d   :  { %p676_p11 = scmp.ne.s32.totalorder %s38_s9, %s675_s17  ;;  %p681_p13 = scmp.lt.s32.totalorder %s675_s17, %s675_s17 }
  0x1f   :  { %p682_p0 = por %p681_p13, %p680_p12 }
  0x21   :  { %p683_p1 = pnand %p682_p0, %p676_p11 }
  0x23   :  { %686 = shalt.err (!%p683_p1)
}
  0x24   :  { %s719_s2 = smov 64   ;;  %s720_s18 = smov 4  }
  0x25   :  { %43 = dma.hbm_to_vmem [thread:$0]  %s954_s4, 1024, %s38_s9, [#allocation7], %s719_s2, %s719_s2, %s720_s18  }
  0x26   :  { %709 = dma.done.wait [#allocation4], 128  }
  0x27   :  { %710 = vsyncadd [#allocation4], 4294967168 }
  0x28   :  { %711 = dma.done.wait [#allocation7], 1024  }
  0x29   :  { %712 = vsyncadd [#allocation7], 4294966272  ;;  %v721_v0 = vmov 0.0   ;;  %vm722_vm0 = vmmov 0   ;;  %v71_v1 = vlaneseq  ;;  %v787_v2 = vld [vmem:[#allocation6] sm:$0xff]   ;;  %v793_v4 = vld [vmem:[#allocation6 + $0x8] sm:$0xff]   ;;  %v214_v27 = vstv %s950_s0 }
  0x2a   :  { %492 = vmatprep.subr.bf16.mxu0 %v721_v0  ;;  %512 = vmatprep.subr.bf16.mxu1 %v721_v0  ;;  %v801_v7 = vld [vmem:[#allocation6 + $0x10] sm:$0xff]   ;;  %v808_v8 = vld [vmem:[%s951_s1] sm:$0xff]  ;;  %v829_v17 = vld [vmem:[#allocation6 + $0x20] sm:$0xff]  }
  0x2b   :  { %508 = vmatprep.mubr.msk.bf16.mxu0 %vm722_vm0, %v721_v0  ;;  %528 = vmatprep.mubr.msk.bf16.mxu1 %vm722_vm0, %v721_v0  ;;  %v789_v3 = vshrl.u32 %v71_v1, 7  ;;  %v810_v9 = vld [vmem:[#allocation3] sm:$0xff]  ;;  %v835_v19 = vld [vmem:[#allocation6 + $0x28] sm:$0xff]   ;;  %v841_v21 = vld [vmem:[#allocation6 + $0x30] sm:$0xff]  }
  0x2c   :  { %493 = vmatpush3.bf16.msra.mxu0 %v787_v2  ;;  %513 = vmatpush3.bf16.msra.mxu1 %v787_v2  ;;  %v815_v10 = vld [vmem:[%s953_s3] sm:$0xf]  ;;  %v222_v39 = vsub.f32 %v808_v8, %v810_v9 }
  0x2d   :  { %494 = vmatprep.subr.bf16.mxu0 %v721_v0  ;;  %514 = vmatprep.subr.bf16.mxu1 %v721_v0  ;;  %v73_v5 = vsub.s32 0, %v789_v3  ;;  %v78_v6 = vsub.s32 1, %v789_v3  ;;  %v821_v13 = vld [vmem:[#allocation6 + $0x18] sm:$0xff]   ;;  %v402_v1 = vsub.s32 2, %v789_v3 }
  0x2e   :  { %v847_v23 = vld [vmem:[#allocation6 + $0x38] sm:$0xff]  }
  0x2f   :  { %v74_v11 = vrot.slane %v815_v10, %v73_v5  ;;  %v79_v12 = vrot.slane %v815_v10, %v78_v6 }
  0x30   :  { %495 = vmatpush3.bf16.msra.mxu0 %v793_v4  ;;  %515 = vmatpush3.bf16.msra.mxu1 %v793_v4 }
  0x31   :  { %496 = vmatprep.subr.bf16.mxu0 %v721_v0  ;;  %516 = vmatprep.subr.bf16.mxu1 %v721_v0  ;;  %v75_v14 = vmul.f32 %v74_v11, %v808_v8  ;;  %v80_v15 = vmul.f32 %v79_v12, %v810_v9 }
  0x33   :  { %v81_v16 = vadd.f32 %v80_v15, %v75_v14 }
  0x34   :  { %497 = vmatpush3.bf16.msra.mxu0 %v801_v7  ;;  %517 = vmatpush3.bf16.msra.mxu1 %v801_v7 }
  0x35   :  { %498 = vmatprep.subr.bf16.mxu0 %v721_v0  ;;  %518 = vmatprep.subr.bf16.mxu1 %v721_v0  ;;  %v82_v18 = vpack.c.bf16 %v81_v16, %v81_v16 }
  0x37   :  { %v83_v20 = vunpack.c.l.bf16 %v82_v18 }
  0x38   :  { %499 = vmatpush3.bf16.msra.mxu0 %v821_v13  ;;  %519 = vmatpush3.bf16.msra.mxu1 %v821_v13 }
  0x39   :  { %500 = vmatprep.subr.bf16.mxu0 %v721_v0  ;;  %520 = vmatprep.subr.bf16.mxu1 %v721_v0  ;;  %v84_v22 = vsub.f32 %v81_v16, %v83_v20 }
  0x3b   :  { %v85_v24 = vpack.c.bf16 %v84_v22, %v84_v22 }
  0x3c   :  { %501 = vmatpush3.bf16.msra.mxu0 %v829_v17  ;;  %521 = vmatpush3.bf16.msra.mxu1 %v829_v17 }
  0x3d   :  { %502 = vmatprep.subr.bf16.mxu0 %v721_v0  ;;  %522 = vmatprep.subr.bf16.mxu1 %v721_v0 }
  0x40   :  { %503 = vmatpush3.bf16.msra.mxu0 %v835_v19  ;;  %523 = vmatpush3.bf16.msra.mxu1 %v835_v19 }
  0x41   :  { %504 = vmatprep.subr.bf16.mxu0 %v721_v0  ;;  %524 = vmatprep.subr.bf16.mxu1 %v721_v0 }
  0x44   :  { %505 = vmatpush3.bf16.msra.mxu0 %v841_v21  ;;  %525 = vmatpush3.bf16.msra.mxu1 %v841_v21 }
  0x45   :  { %506 = vmatprep.subr.bf16.mxu0 %v721_v0  ;;  %526 = vmatprep.subr.bf16.mxu1 %v721_v0 }
  0x48   :  { %507 = vmatpush3.bf16.msra.mxu0 %v847_v23  ;;  %527 = vmatpush3.bf16.msra.mxu1 %v847_v23 }
  0x49   :  { %532 = vmatprep.subr.bf16.mxu0 %v721_v0  ;;  %572 = vmatprep.subr.bf16.mxu1 %v721_v0 }
  0x4b   :  { %509 = vmatmul.mubr.bf16.vlgmr.msra.gmra.mrb[0].mxu0 %v85_v24  ;;  %529 = vmatmul.mubr.bf16.vlgmr.msra.gmra.mrb[0].mxu1 %v82_v18 }
  0x4c   :  { %533 = vmatpush3.bf16.msra.mxu0 %v787_v2  ;;  %548 = vmatprep.mubr.msk.bf16.mxu0 %vm722_vm0, %v721_v0 }
  0x4d   :  { %534 = vmatprep.subr.bf16.mxu0 %v721_v0  ;;  %573 = vmatpush3.bf16.msra.mxu1 %v787_v2 }
  0x4e   :  { %574 = vmatprep.subr.bf16.mxu1 %v721_v0  ;;  %588 = vmatprep.mubr.msk.bf16.mxu1 %vm722_vm0, %v721_v0 }
  0x50   :  { %535 = vmatpush3.bf16.msra.mxu0 %v793_v4 }
  0x51   :  { %536 = vmatprep.subr.bf16.mxu0 %v721_v0  ;;  %575 = vmatpush3.bf16.msra.mxu1 %v793_v4 }
  0x52   :  { %576 = vmatprep.subr.bf16.mxu1 %v721_v0 }
  0x54   :  { %537 = vmatpush3.bf16.msra.mxu0 %v801_v7 }
  0x55   :  { %538 = vmatprep.subr.bf16.mxu0 %v721_v0  ;;  %577 = vmatpush3.bf16.msra.mxu1 %v801_v7 }
  0x56   :  { %578 = vmatprep.subr.bf16.mxu1 %v721_v0 }
  0x58   :  { %539 = vmatpush3.bf16.msra.mxu0 %v821_v13 }
  0x59   :  { %540 = vmatprep.subr.bf16.mxu0 %v721_v0  ;;  %579 = vmatpush3.bf16.msra.mxu1 %v821_v13 }
  0x5a   :  { %580 = vmatprep.subr.bf16.mxu1 %v721_v0 }
  0x5c   :  { %541 = vmatpush3.bf16.msra.mxu0 %v829_v17 }
  0x5d   :  { %542 = vmatprep.subr.bf16.mxu0 %v721_v0  ;;  %581 = vmatpush3.bf16.msra.mxu1 %v829_v17 }
  0x5e   :  { %582 = vmatprep.subr.bf16.mxu1 %v721_v0 }
  0x60   :  { %543 = vmatpush3.bf16.msra.mxu0 %v835_v19 }
  0x61   :  { %544 = vmatprep.subr.bf16.mxu0 %v721_v0  ;;  %583 = vmatpush3.bf16.msra.mxu1 %v835_v19 }
  0x62   :  { %584 = vmatprep.subr.bf16.mxu1 %v721_v0 }
  0x64   :  { %545 = vmatpush3.bf16.msra.mxu0 %v841_v21 }
  0x65   :  { %546 = vmatprep.subr.bf16.mxu0 %v721_v0  ;;  %585 = vmatpush3.bf16.msra.mxu1 %v841_v21 }
  0x66   :  { %586 = vmatprep.subr.bf16.mxu1 %v721_v0 }
  0x68   :  { %547 = vmatpush3.bf16.msra.mxu0 %v847_v23 }
  0x69   :  { %552 = vmatprep.subr.bf16.mxu0 %v721_v0  ;;  %587 = vmatpush3.bf16.msra.mxu1 %v847_v23 }
  0x6a   :  { %592 = vmatprep.subr.bf16.mxu1 %v721_v0 }
 0x11e   :  { %v168_v25 = vpop.f32.mrb[0].mxu0  ;;  %v208_v26 = vpop.f32.mrb[0].mxu1 }
 0x11f   :  { %v209_v28 = vadd.f32 %v208_v26, %v168_v25  ;;  %v510_v29 = vpop.f32.mrb[1].mxu0  ;;  %v530_v30 = vpop.f32.mrb[1].mxu1 }
 0x120   :  { %v171_v31 = vpop.f32.mrb[2].mxu0  ;;  %v211_v32 = vpop.f32.mrb[2].mxu1 }
 0x121   :  { %v215_v33 = vadd.f32 %v214_v27, %v209_v28  ;;  %v511_v34 = vpop.f32.mrb[3].mxu0  ;;  %v531_v35 = vpop.f32.mrb[3].mxu1 }
 0x123   :  { %v437_v36 = vmul.f32 -1.442695, %v215_v33 }
 0x125   :  { %637 = vpow2.f32 %v437_v36 }
 0x12f   :  { %v638_v37 = vpop.eup %637 }
 0x130   :  { %v219_v38 = vadd.f32 1.0, %v638_v37 }
 0x132   :  { %639 = vrcp.f32 %v219_v38 }
 0x13c   :  { %v640_v40 = vpop.eup %639 }
 0x13d   :  { %v223_v41 = vmul.f32 %v640_v40, %v222_v39 }
 0x13f   :  { %v224_v42 = vadd.f32 %v223_v41, %v810_v9 }
 0x141   :  { %v225_v43 = vpack.c.bf16 %v224_v42, %v224_v42 }
 0x143   :  { %v226_v44 = vunpack.c.l.bf16 %v225_v43 }
 0x145   :  { %v227_v45 = vsub.f32 %v224_v42, %v226_v44 }
 0x147   :  { %v228_v46 = vpack.c.bf16 %v227_v45, %v227_v45 }
 0x149   :  { %549 = vmatmul.mubr.bf16.vlgmr.msra.gmra.mrb[4].mxu0 %v228_v46 }
 0x14a   :  { %553 = vmatpush3.bf16.msra.mxu0 %v787_v2  ;;  %568 = vmatprep.mubr.msk.bf16.mxu0 %vm722_vm0, %v721_v0 }
 0x14b   :  { %554 = vmatprep.subr.bf16.mxu0 %v721_v0 }
 0x14e   :  { %555 = vmatpush3.bf16.msra.mxu0 %v793_v4 }
 0x14f   :  { %556 = vmatprep.subr.bf16.mxu0 %v721_v0 }
 0x152   :  { %557 = vmatpush3.bf16.msra.mxu0 %v801_v7 }
 0x153   :  { %558 = vmatprep.subr.bf16.mxu0 %v721_v0 }
 0x156   :  { %559 = vmatpush3.bf16.msra.mxu0 %v821_v13 }
 0x157   :  { %560 = vmatprep.subr.bf16.mxu0 %v721_v0 }
 0x15a   :  { %561 = vmatpush3.bf16.msra.mxu0 %v829_v17 }
 0x15b   :  { %562 = vmatprep.subr.bf16.mxu0 %v721_v0 }
 0x15e   :  { %563 = vmatpush3.bf16.msra.mxu0 %v835_v19 }
 0x15f   :  { %564 = vmatprep.subr.bf16.mxu0 %v721_v0 }
 0x162   :  { %565 = vmatpush3.bf16.msra.mxu0 %v841_v21 }
 0x163   :  { %566 = vmatprep.subr.bf16.mxu0 %v721_v0 }
 0x166   :  { %567 = vmatpush3.bf16.msra.mxu0 %v847_v23 }
 0x169   :  { %569 = vmatmul.mubr.bf16.vlgmr.msra.gmra.mrb[4].mxu0 %v225_v43 }
 0x23c   :  { %v303_v47 = vpop.f32.mrb[4].mxu0 }
 0x23d   :  { %v309_v48 = vmul.f32 0.03125, %v303_v47  ;;  %v570_v49 = vpop.f32.mrb[5].mxu0 }
 0x23e   :  { %v306_v50 = vpop.f32.mrb[6].mxu0 }
 0x23f   :  { %v310_v51 = vsub.f32 %v224_v42, %v309_v48  ;;  %v571_v52 = vpop.f32.mrb[7].mxu0 }
 0x241   :  { %v311_v53 = vmul.f32 %v310_v51, %v310_v51 }
 0x243   :  { %v312_v54 = vpack.c.bf16 %v311_v53, %v311_v53 }
 0x245   :  { %v313_v55 = vunpack.c.l.bf16 %v312_v54 }
 0x247   :  { %v314_v56 = vsub.f32 %v311_v53, %v313_v55 }
 0x249   :  { %v315_v57 = vpack.c.bf16 %v314_v56, %v314_v56 }
 0x24b   :  { %589 = vmatmul.mubr.bf16.vlgmr.msra.gmra.mrb[4].mxu1 %v315_v57 }
 0x24c   :  { %593 = vmatpush3.bf16.msra.mxu1 %v787_v2  ;;  %608 = vmatprep.mubr.msk.bf16.mxu1 %vm722_vm0, %v721_v0  ;;  %v407_v2 = vsub.s32 3, %v789_v3 }
 0x24d   :  { %594 = vmatprep.subr.bf16.mxu1 %v721_v0 }
 0x250   :  { %595 = vmatpush3.bf16.msra.mxu1 %v793_v4  ;;  %v403_v4 = vrot.slane %v815_v10, %v402_v1 }
 0x251   :  { %596 = vmatprep.subr.bf16.mxu1 %v721_v0 }
 0x254   :  { %597 = vmatpush3.bf16.msra.mxu1 %v801_v7 }
 0x255   :  { %598 = vmatprep.subr.bf16.mxu1 %v721_v0 }
 0x258   :  { %599 = vmatpush3.bf16.msra.mxu1 %v821_v13 }
 0x259   :  { %600 = vmatprep.subr.bf16.mxu1 %v721_v0 }
 0x25c   :  { %601 = vmatpush3.bf16.msra.mxu1 %v829_v17 }
 0x25d   :  { %602 = vmatprep.subr.bf16.mxu1 %v721_v0 }
 0x260   :  { %603 = vmatpush3.bf16.msra.mxu1 %v835_v19 }
 0x261   :  { %604 = vmatprep.subr.bf16.mxu1 %v721_v0 }
 0x264   :  { %605 = vmatpush3.bf16.msra.mxu1 %v841_v21 }
 0x265   :  { %606 = vmatprep.subr.bf16.mxu1 %v721_v0  ;;  %v408_v0 = vrot.slane %v815_v10, %v407_v2 }
 0x268   :  { %607 = vmatpush3.bf16.msra.mxu1 %v847_v23 }
 0x26b   :  { %609 = vmatmul.mubr.bf16.vlgmr.msra.gmra.mrb[4].mxu1 %v312_v54 }
 0x33e   :  { %v390_v58 = vpop.f32.mrb[4].mxu1 }
 0x33f   :  { %v396_v59 = vmul.f32 0.03125, %v390_v58  ;;  %v610_v60 = vpop.f32.mrb[5].mxu1 }
 0x340   :  { %v393_v61 = vpop.f32.mrb[6].mxu1 }
 0x341   :  { %v397_v62 = vadd.f32 1e-05, %v396_v59  ;;  %v611_v63 = vpop.f32.mrb[7].mxu1 }
 0x343   :  { %641 = vrsqrt.f32 %v397_v62 }
 0x34d   :  { %v642_v5 = vpop.eup %641 }
 0x34e   :  { %v399_v6 = vmul.f32 %v642_v5, %v310_v51 }
 0x350   :  { %v404_v7 = vmul.f32 %v403_v4, %v399_v6 }
 0x352   :  { %v409_v8 = vadd.f32 %v408_v0, %v404_v7 }
 0x354   :  { %410 = vst [vmem:[#allocation8] sm:$0xff] %v409_v8 }
 0x355   :  { %415 = vsyncadd [#allocation5], 96  ;;  %s723_s0 = smov [#allocation8]  }
 0x356   :  { %s416_s24 = sshll.u32 %s723_s0, 4  ;;  %s417_s24 = int_to_ptr.vmem [resolvable:$true] %s416_s24 }
 0x357   :  { %s687_s25 = scalar_lea.vmem %s417_s24, 32  ;;  %s691_s26 = scalar_lea.vmem %s417_s24, 128 }
 0x358   :  { %p688_p2 = scmp.ne.s32.totalorder %s417_s24, %s687_s25  ;;  %p692_p3 = scmp.lt.s32.totalorder %s417_s24, %s417_s24 }
 0x359   :  { %p693_p4 = scmp.lt.s32.totalorder %s691_s26, %s687_s25 }
 0x35b   :  { %p694_p5 = por %p693_p4, %p692_p3 }
 0x35d   :  { %p695_p6 = pnand %p694_p5, %p688_p2 }
 0x35f   :  { %698 = shalt.err (!%p695_p6)
}
 0x360   :  { %s699_s6 = scalar_lea.hbm %s955_s5, 32 }
 0x361   :  { %p700_p7 = scmp.ne.s32.totalorder %s955_s5, %s699_s6  ;;  %p703_p8 = scmp.lt.u32.totalorder %s699_s6, %s955_s5 }
 0x363   :  { %p705_p9 = pnand %p703_p8, %p700_p7 }
 0x365   :  { %708 = shalt.err (!%p705_p9)
}
 0x366   :  { %422 = dma.vmem_to_hbm [thread:$0]  %s417_s24, 32, %s955_s5, [#allocation5], %s716_s29, %s716_s29, %s717_s30  }
 0x367   :  { %713 = dma.done.wait [#allocation5], 128  }
 0x368   :  { %714 = vsyncadd [#allocation5], 4294967168 }
 0x369   :  { %426 = vsyncpa [#allocation4], 1 }
 0x36a   :  { %427 = vsyncpa [#allocation7], 1 }
 0x36b   :  { %428 = vsyncpa [#allocation5], 1 }

</bundles_post_ra>
